<compile_context>
chip_gen: v7x
topology: tpu7x:2x2x1
jax: 0.10.0
libtpu: 0.0.40
codegen_flags: <defaults>
</compile_context>

<pallas_src>
import functools
import math

import jax
import jax.numpy as jnp
from jax import lax
from jax.experimental import pallas as pl
from jax.experimental.pallas import tpu as pltpu

# --- GPTConfig-consistent small hyperparameters -----------------------------
N_HEAD = 4
N_EMBD = 32
HEAD_DIM = N_EMBD // N_HEAD          # 8 (must be even for rotary)
LENGTH_FACTOR = 3                    # k_gt_q=True: T_kv == T_q * LENGTH_FACTOR
RMS_EPS = 1.1920929e-07              # torch.finfo(torch.float32).eps (F.rms_norm default)
ROPE_BASE = 10000.0

# Review item (v5e): set True to feed the MXU bf16 operands (f32 accumulation).
# Default False keeps the f32 semantics of the reference module exactly.
USE_BF16_MXU = False


def _mxu(a):
    return a.astype(jnp.bfloat16) if USE_BF16_MXU else a


def _rope_tables(seq_len, head_dim, n_head):
    """Full-width (seq_len, n_head*head_dim) cos / signed-sin tables.

    Per head:  y = x * cos_full + roll_half(x) * sin_signed, with
    cos_full = [cos, cos] and sin_signed = [sin, -sin] -- algebraically identical
    to the PyTorch apply_rotary_emb.  Tables are rounded through bf16 to match
    Rotary's bfloat16 cache.
    """
    inv_freq = 1.0 / (ROPE_BASE ** (jnp.arange(0, head_dim, 2, dtype=jnp.float32) / head_dim))
    t = jnp.arange(seq_len, dtype=jnp.float32)
    freqs = jnp.outer(t, inv_freq)                                   # (T, D/2)
    cos = jnp.cos(freqs).astype(jnp.bfloat16).astype(jnp.float32)
    sin = jnp.sin(freqs).astype(jnp.bfloat16).astype(jnp.float32)
    cos_full = jnp.concatenate([cos, cos], axis=-1)                  # (T, D)
    sin_signed = jnp.concatenate([sin, -sin], axis=-1)               # (T, D)
    return jnp.tile(cos_full, (1, n_head)), jnp.tile(sin_signed, (1, n_head))


def cross_attn_kernel(xq_ref, xkv_ref, wq_ref, wkv_ref, wps_ref, rope_ref, out_ref):
    C = N_EMBD
    inv_d = 1.0 / HEAD_DIM

    x_q = xq_ref[0]                                   # (T_q, C)
    wq_pack = _mxu(wq_ref[...])                       # (C, 2C)  [WqT | WqT_rollhalf]
    wkv_pack = _mxu(wkv_ref[...])                     # (C, 3C)  [WkT | WkT_rollhalf | WvT]
    wpT = wps_ref[0]                                  # (C, C)   c_proj.weight.T
    same_head = wps_ref[1]                            # (C, C)   1.0 iff same head

    # q projection: one (T_q,C)x(C,2C) matmul yields q and roll_half(q).
    qq = jnp.dot(_mxu(x_q), wq_pack, preferred_element_type=jnp.float32)
    q, q_roll = qq[:, :C], qq[:, C:]

    # per-head F.rms_norm as an MXU same-head reduction (kept in f32).
    ms_q = jnp.dot(q * q, same_head, preferred_element_type=jnp.float32) * inv_d
    inv_q = lax.rsqrt(ms_q + RMS_EPS)
    # rotary embedding (the q tables carry the 1/sqrt(head_dim) attention scale).
    q_rope = (q * inv_q) * rope_ref[0, 0] + (q_roll * inv_q) * rope_ref[0, 1]

    # Structured mask: query t attends exactly kv tokens t*LF + l, l < LF.
    s_list, v_list = [], []
    for l in range(LENGTH_FACTOR):                    # static unroll
        x_l = xkv_ref[0, l]                           # (T_q, C) kv stream l
        kkv = jnp.dot(_mxu(x_l), wkv_pack, preferred_element_type=jnp.float32)
        k, k_roll, v = kkv[:, :C], kkv[:, C:2 * C], kkv[:, 2 * C:]
        ms_k = jnp.dot(k * k, same_head, preferred_element_type=jnp.float32) * inv_d
        inv_k = lax.rsqrt(ms_k + RMS_EPS)
        k_rope = (k * inv_k) * rope_ref[1 + l, 0] + (k_roll * inv_k) * rope_ref[1 + l, 1]
        # per-head q.k score broadcast over the head's lanes -> (T_q, C)
        s_list.append(jnp.dot(q_rope * k_rope, same_head,
                              preferred_element_type=jnp.float32))
        v_list.append(v)

    # softmax over the LENGTH_FACTOR allowed slots (no -inf path possible)
    m = functools.reduce(jnp.maximum, s_list)
    e_list = [jnp.exp(s - m) for s in s_list]
    denom = functools.reduce(jnp.add, e_list)
    inv_den = pl.reciprocal(denom, approx=True)
    y = functools.reduce(jnp.add, [e * v for e, v in zip(e_list, v_list)]) * inv_den

    out = jnp.dot(_mxu(y), _mxu(wpT), preferred_element_type=jnp.float32)
    out_ref[0] = out.astype(out_ref.dtype)


def cross_attention(x_q, x_kv, wq, wk, wv, wp):
    B, T_q, C = x_q.shape
    _, T_kv, _ = x_kv.shape
    H, D, LF = N_HEAD, HEAD_DIM, LENGTH_FACTOR
    assert C == N_EMBD
    assert T_kv == T_q * LF   # k_gt_q=True layout
    # TODO(synk): only the k_gt_q=True mask (default config) is implemented here;
    #             k_gt_q=False degenerates to y[q] = v[q // length_factor].
    d = D // 2

    # ---- wrapper-side layout plumbing (free, outside the kernel) -----------
    idx = jnp.arange(C)
    head_of = idx // D
    # within-head half-roll permutation: output lane h*D+j <- lane h*D+((j+d)%D)
    perm = head_of * D + ((idx % D) + d) % D
    same_head = (head_of[:, None] == head_of[None, :]).astype(jnp.float32)   # (C, C)

    wqT, wkT, wvT, wpT = wq.T, wk.T, wv.T, wp.T        # nn.Linear: x @ W.T == x @ wT
    wq_pack = jnp.concatenate([wqT, wqT[:, perm]], axis=1)            # (C, 2C)
    wkv_pack = jnp.concatenate([wkT, wkT[:, perm], wvT], axis=1)      # (C, 3C)
    wps = jnp.stack([wpT, same_head])                                 # (2, C, C)

    scale = 1.0 / math.sqrt(D)
    cos_q, sin_q = _rope_tables(T_q, D, H)
    cos_k, sin_k = _rope_tables(T_kv, D, H)
    rope_entries = [jnp.stack([cos_q * scale, sin_q * scale])]        # scale folded into q rope
    for l in range(LF):
        rope_entries.append(jnp.stack([cos_k[l::LF], sin_k[l::LF]]))  # kv stream l positions
    rope = jnp.stack(rope_entries)                                    # (1+LF, 2, T_q, C)

    # kv stream l holds tokens at positions t*LF + l (the LF keys query t attends to)
    x_kv_streams = jnp.transpose(x_kv.reshape(B, T_q, LF, C), (0, 2, 1, 3))  # (B, LF, T_q, C)

    return pl.pallas_call(
        cross_attn_kernel,
        out_shape=jax.ShapeDtypeStruct((B, T_q, C), x_q.dtype),
        grid_spec=pltpu.PrefetchScalarGridSpec(
            num_scalar_prefetch=0,
            grid=(B,),
            in_specs=[
                pl.BlockSpec((1, T_q, C), lambda b: (b, 0, 0)),
                pl.BlockSpec((1, LF, T_q, C), lambda b: (b, 0, 0, 0)),
                pl.BlockSpec((C, 2 * C), lambda b: (0, 0)),
                pl.BlockSpec((C, 3 * C), lambda b: (0, 0)),
                pl.BlockSpec((2, C, C), lambda b: (0, 0, 0)),
                pl.BlockSpec((1 + LF, 2, T_q, C), lambda b: (0, 0, 0, 0)),
            ],
            out_specs=pl.BlockSpec((1, T_q, C), lambda b: (b, 0, 0)),
        ),
        compiler_params=pltpu.CompilerParams(
            dimension_semantics=("parallel",)),
    )(x_q, x_kv_streams, wq_pack, wkv_pack, wps, rope)


if __name__ == "__main__":
    key = jax.random.PRNGKey(0)
    k_xq, k_xkv, k_wq, k_wk, k_wv, k_wp = jax.random.split(key, 6)

    B, T_q = 2, 8
    T_kv = T_q * LENGTH_FACTOR  # 24
    C = N_EMBD

    x_q = jax.random.normal(k_xq, (B, T_q, C), dtype=jnp.float32)
    x_kv = jax.random.normal(k_xkv, (B, T_kv, C), dtype=jnp.float32)

    # deterministic synthetic weights (nn.Linear(C, C, bias=False) shapes)
    wq = 0.02 * jax.random.normal(k_wq, (C, C), dtype=jnp.float32)
    wk = 0.02 * jax.random.normal(k_wk, (C, C), dtype=jnp.float32)
    wv = 0.02 * jax.random.normal(k_wv, (C, C), dtype=jnp.float32)
    wp = 0.02 * jax.random.normal(k_wp, (C, C), dtype=jnp.float32)

    y = cross_attention(x_q, x_kv, wq, wk, wv, wp)
    jax.block_until_ready(y)
    assert y.shape == (B, T_q, C) and y.dtype == jnp.float32
    assert bool(jnp.all(jnp.isfinite(y)))
    print("KERNEL_OK")
</pallas_src>

<mosaic_0001>
module attributes {stable_mosaic.version = 11 : i64} {
  func.func @cross_attn_kernel(%arg0: i32, %arg1: memref<1x8x32xf32, #tpu.memory_space<vmem>>, %arg2: memref<1x3x8x32xf32, #tpu.memory_space<vmem>>, %arg3: memref<32x64xf32, #tpu.memory_space<vmem>>, %arg4: memref<32x96xf32, #tpu.memory_space<vmem>>, %arg5: memref<2x32x32xf32, #tpu.memory_space<vmem>>, %arg6: memref<4x2x8x32xf32, #tpu.memory_space<vmem>>, %arg7: memref<1x8x32xf32, #tpu.memory_space<vmem>>) attributes {dimension_semantics = [#tpu.dimension_semantics<parallel>], iteration_bounds = array<i64: 2>, scalar_prefetch = 0 : i64, scratch_operands = 0 : i64, tpu.core_type = #tpu.core_type<tc>, window_params = [{transform_indices = @transform_0, window_bounds = array<i64: 1, 8, 32>}, {transform_indices = @transform_1, window_bounds = array<i64: 1, 3, 8, 32>}, {pipeline_mode = #tpu.pipeline_mode<synchronous>, transform_indices = @transform_2, window_bounds = array<i64: 32, 64>}, {pipeline_mode = #tpu.pipeline_mode<synchronous>, transform_indices = @transform_3, window_bounds = array<i64: 32, 96>}, {pipeline_mode = #tpu.pipeline_mode<synchronous>, transform_indices = @transform_4, window_bounds = array<i64: 2, 32, 32>}, {pipeline_mode = #tpu.pipeline_mode<synchronous>, transform_indices = @transform_5, window_bounds = array<i64: 4, 2, 8, 32>}, {transform_indices = @transform_6, window_bounds = array<i64: 1, 8, 32>}]} {
    %c0 = arith.constant 0 : index
    %c0_0 = arith.constant 0 : index
    %c0_1 = arith.constant 0 : index
    %0 = vector.load %arg1[%c0, %c0_0, %c0_1] : memref<1x8x32xf32, #tpu.memory_space<vmem>>, vector<1x8x32xf32>
    %1 = vector.shape_cast %0 : vector<1x8x32xf32> to vector<8x32xf32>
    %c0_2 = arith.constant 0 : index
    %c0_3 = arith.constant 0 : index
    %2 = vector.load %arg3[%c0_2, %c0_3] : memref<32x64xf32, #tpu.memory_space<vmem>>, vector<32x64xf32>
    %c0_4 = arith.constant 0 : index
    %c0_5 = arith.constant 0 : index
    %3 = vector.load %arg4[%c0_4, %c0_5] : memref<32x96xf32, #tpu.memory_space<vmem>>, vector<32x96xf32>
    %c0_6 = arith.constant 0 : index
    %c0_7 = arith.constant 0 : index
    %c0_8 = arith.constant 0 : index
    %4 = vector.load %arg5[%c0_6, %c0_7, %c0_8] : memref<2x32x32xf32, #tpu.memory_space<vmem>>, vector<1x32x32xf32>
    %5 = vector.shape_cast %4 : vector<1x32x32xf32> to vector<32x32xf32>
    %c1 = arith.constant 1 : index
    %c0_9 = arith.constant 0 : index
    %c0_10 = arith.constant 0 : index
    %6 = vector.load %arg5[%c1, %c0_9, %c0_10] : memref<2x32x32xf32, #tpu.memory_space<vmem>>, vector<1x32x32xf32>
    %7 = vector.shape_cast %6 : vector<1x32x32xf32> to vector<32x32xf32>
    %cst = arith.constant dense<0.000000e+00> : vector<8x64xf32>
    %8 = tpu.matmul %1, %2, %cst {dimension_numbers = #tpu.dot_dimension_numbers<[1], [0], [0], [1], [0, 0, 1, 1], [], []>} : vector<8x32xf32>, vector<32x64xf32>, vector<8x64xf32> -> vector<8x64xf32>
    %9 = vector.extract_strided_slice %8 {offsets = [0, 0], sizes = [8, 32], strides = [1, 1]} : vector<8x64xf32> to vector<8x32xf32>
    %10 = vector.extract_strided_slice %8 {offsets = [0, 32], sizes = [8, 32], strides = [1, 1]} : vector<8x64xf32> to vector<8x32xf32>
    %11 = arith.mulf %9, %9 : vector<8x32xf32>
    %cst_11 = arith.constant dense<0.000000e+00> : vector<8x32xf32>
    %12 = tpu.matmul %11, %7, %cst_11 {dimension_numbers = #tpu.dot_dimension_numbers<[1], [0], [0], [1], [0, 0, 1, 1], [], []>} : vector<8x32xf32>, vector<32x32xf32>, vector<8x32xf32> -> vector<8x32xf32>
    %cst_12 = arith.constant 1.250000e-01 : f32
    %13 = vector.broadcast %cst_12 : f32 to vector<8x32xf32>
    %14 = arith.mulf %12, %13 : vector<8x32xf32>
    %cst_13 = arith.constant 1.1920929E-7 : f32
    %15 = vector.broadcast %cst_13 : f32 to vector<8x32xf32>
    %16 = arith.addf %14, %15 : vector<8x32xf32>
    %17 = math.rsqrt %16 : vector<8x32xf32>
    %18 = arith.mulf %9, %17 : vector<8x32xf32>
    %c0_14 = arith.constant 0 : index
    %c0_15 = arith.constant 0 : index
    %c0_16 = arith.constant 0 : index
    %c0_17 = arith.constant 0 : index
    %19 = vector.load %arg6[%c0_14, %c0_15, %c0_16, %c0_17] : memref<4x2x8x32xf32, #tpu.memory_space<vmem>>, vector<1x1x8x32xf32>
    %20 = vector.shape_cast %19 : vector<1x1x8x32xf32> to vector<8x32xf32>
    %21 = arith.mulf %18, %20 : vector<8x32xf32>
    %22 = arith.mulf %10, %17 : vector<8x32xf32>
    %c0_18 = arith.constant 0 : index
    %c1_19 = arith.constant 1 : index
    %c0_20 = arith.constant 0 : index
    %c0_21 = arith.constant 0 : index
    %23 = vector.load %arg6[%c0_18, %c1_19, %c0_20, %c0_21] : memref<4x2x8x32xf32, #tpu.memory_space<vmem>>, vector<1x1x8x32xf32>
    %24 = vector.shape_cast %23 : vector<1x1x8x32xf32> to vector<8x32xf32>
    %25 = arith.mulf %22, %24 : vector<8x32xf32>
    %26 = arith.addf %21, %25 : vector<8x32xf32>
    %c0_22 = arith.constant 0 : index
    %c0_23 = arith.constant 0 : index
    %c0_24 = arith.constant 0 : index
    %c0_25 = arith.constant 0 : index
    %27 = vector.load %arg2[%c0_22, %c0_23, %c0_24, %c0_25] : memref<1x3x8x32xf32, #tpu.memory_space<vmem>>, vector<1x1x8x32xf32>
    %28 = vector.shape_cast %27 : vector<1x1x8x32xf32> to vector<8x32xf32>
    %cst_26 = arith.constant dense<0.000000e+00> : vector<8x96xf32>
    %29 = tpu.matmul %28, %3, %cst_26 {dimension_numbers = #tpu.dot_dimension_numbers<[1], [0], [0], [1], [0, 0, 1, 1], [], []>} : vector<8x32xf32>, vector<32x96xf32>, vector<8x96xf32> -> vector<8x96xf32>
    %30 = vector.extract_strided_slice %29 {offsets = [0, 0], sizes = [8, 32], strides = [1, 1]} : vector<8x96xf32> to vector<8x32xf32>
    %31 = vector.extract_strided_slice %29 {offsets = [0, 32], sizes = [8, 32], strides = [1, 1]} : vector<8x96xf32> to vector<8x32xf32>
    %32 = vector.extract_strided_slice %29 {offsets = [0, 64], sizes = [8, 32], strides = [1, 1]} : vector<8x96xf32> to vector<8x32xf32>
    %33 = arith.mulf %30, %30 : vector<8x32xf32>
    %cst_27 = arith.constant dense<0.000000e+00> : vector<8x32xf32>
    %34 = tpu.matmul %33, %7, %cst_27 {dimension_numbers = #tpu.dot_dimension_numbers<[1], [0], [0], [1], [0, 0, 1, 1], [], []>} : vector<8x32xf32>, vector<32x32xf32>, vector<8x32xf32> -> vector<8x32xf32>
    %cst_28 = arith.constant 1.250000e-01 : f32
    %35 = vector.broadcast %cst_28 : f32 to vector<8x32xf32>
    %36 = arith.mulf %34, %35 : vector<8x32xf32>
    %cst_29 = arith.constant 1.1920929E-7 : f32
    %37 = vector.broadcast %cst_29 : f32 to vector<8x32xf32>
    %38 = arith.addf %36, %37 : vector<8x32xf32>
    %39 = math.rsqrt %38 : vector<8x32xf32>
    %40 = arith.mulf %30, %39 : vector<8x32xf32>
    %c1_30 = arith.constant 1 : index
    %c0_31 = arith.constant 0 : index
    %c0_32 = arith.constant 0 : index
    %c0_33 = arith.constant 0 : index
    %41 = vector.load %arg6[%c1_30, %c0_31, %c0_32, %c0_33] : memref<4x2x8x32xf32, #tpu.memory_space<vmem>>, vector<1x1x8x32xf32>
    %42 = vector.shape_cast %41 : vector<1x1x8x32xf32> to vector<8x32xf32>
    %43 = arith.mulf %40, %42 : vector<8x32xf32>
    %44 = arith.mulf %31, %39 : vector<8x32xf32>
    %c1_34 = arith.constant 1 : index
    %c1_35 = arith.constant 1 : index
    %c0_36 = arith.constant 0 : index
    %c0_37 = arith.constant 0 : index
    %45 = vector.load %arg6[%c1_34, %c1_35, %c0_36, %c0_37] : memref<4x2x8x32xf32, #tpu.memory_space<vmem>>, vector<1x1x8x32xf32>
    %46 = vector.shape_cast %45 : vector<1x1x8x32xf32> to vector<8x32xf32>
    %47 = arith.mulf %44, %46 : vector<8x32xf32>
    %48 = arith.addf %43, %47 : vector<8x32xf32>
    %49 = arith.mulf %26, %48 : vector<8x32xf32>
    %cst_38 = arith.constant dense<0.000000e+00> : vector<8x32xf32>
    %50 = tpu.matmul %49, %7, %cst_38 {dimension_numbers = #tpu.dot_dimension_numbers<[1], [0], [0], [1], [0, 0, 1, 1], [], []>} : vector<8x32xf32>, vector<32x32xf32>, vector<8x32xf32> -> vector<8x32xf32>
    %c0_39 = arith.constant 0 : index
    %c1_40 = arith.constant 1 : index
    %c0_41 = arith.constant 0 : index
    %c0_42 = arith.constant 0 : index
    %51 = vector.load %arg2[%c0_39, %c1_40, %c0_41, %c0_42] : memref<1x3x8x32xf32, #tpu.memory_space<vmem>>, vector<1x1x8x32xf32>
    %52 = vector.shape_cast %51 : vector<1x1x8x32xf32> to vector<8x32xf32>
    %cst_43 = arith.constant dense<0.000000e+00> : vector<8x96xf32>
    %53 = tpu.matmul %52, %3, %cst_43 {dimension_numbers = #tpu.dot_dimension_numbers<[1], [0], [0], [1], [0, 0, 1, 1], [], []>} : vector<8x32xf32>, vector<32x96xf32>, vector<8x96xf32> -> vector<8x96xf32>
    %54 = vector.extract_strided_slice %53 {offsets = [0, 0], sizes = [8, 32], strides = [1, 1]} : vector<8x96xf32> to vector<8x32xf32>
    %55 = vector.extract_strided_slice %53 {offsets = [0, 32], sizes = [8, 32], strides = [1, 1]} : vector<8x96xf32> to vector<8x32xf32>
    %56 = vector.extract_strided_slice %53 {offsets = [0, 64], sizes = [8, 32], strides = [1, 1]} : vector<8x96xf32> to vector<8x32xf32>
    %57 = arith.mulf %54, %54 : vector<8x32xf32>
    %cst_44 = arith.constant dense<0.000000e+00> : vector<8x32xf32>
    %58 = tpu.matmul %57, %7, %cst_44 {dimension_numbers = #tpu.dot_dimension_numbers<[1], [0], [0], [1], [0, 0, 1, 1], [], []>} : vector<8x32xf32>, vector<32x32xf32>, vector<8x32xf32> -> vector<8x32xf32>
    %cst_45 = arith.constant 1.250000e-01 : f32
    %59 = vector.broadcast %cst_45 : f32 to vector<8x32xf32>
    %60 = arith.mulf %58, %59 : vector<8x32xf32>
    %cst_46 = arith.constant 1.1920929E-7 : f32
    %61 = vector.broadcast %cst_46 : f32 to vector<8x32xf32>
    %62 = arith.addf %60, %61 : vector<8x32xf32>
    %63 = math.rsqrt %62 : vector<8x32xf32>
    %64 = arith.mulf %54, %63 : vector<8x32xf32>
    %c2 = arith.constant 2 : index
    %c0_47 = arith.constant 0 : index
    %c0_48 = arith.constant 0 : index
    %c0_49 = arith.constant 0 : index
    %65 = vector.load %arg6[%c2, %c0_47, %c0_48, %c0_49] : memref<4x2x8x32xf32, #tpu.memory_space<vmem>>, vector<1x1x8x32xf32>
    %66 = vector.shape_cast %65 : vector<1x1x8x32xf32> to vector<8x32xf32>
    %67 = arith.mulf %64, %66 : vector<8x32xf32>
    %68 = arith.mulf %55, %63 : vector<8x32xf32>
    %c2_50 = arith.constant 2 : index
    %c1_51 = arith.constant 1 : index
    %c0_52 = arith.constant 0 : index
    %c0_53 = arith.constant 0 : index
    %69 = vector.load %arg6[%c2_50, %c1_51, %c0_52, %c0_53] : memref<4x2x8x32xf32, #tpu.memory_space<vmem>>, vector<1x1x8x32xf32>
    %70 = vector.shape_cast %69 : vector<1x1x8x32xf32> to vector<8x32xf32>
    %71 = arith.mulf %68, %70 : vector<8x32xf32>
    %72 = arith.addf %67, %71 : vector<8x32xf32>
    %73 = arith.mulf %26, %72 : vector<8x32xf32>
    %cst_54 = arith.constant dense<0.000000e+00> : vector<8x32xf32>
    %74 = tpu.matmul %73, %7, %cst_54 {dimension_numbers = #tpu.dot_dimension_numbers<[1], [0], [0], [1], [0, 0, 1, 1], [], []>} : vector<8x32xf32>, vector<32x32xf32>, vector<8x32xf32> -> vector<8x32xf32>
    %c0_55 = arith.constant 0 : index
    %c2_56 = arith.constant 2 : index
    %c0_57 = arith.constant 0 : index
    %c0_58 = arith.constant 0 : index
    %75 = vector.load %arg2[%c0_55, %c2_56, %c0_57, %c0_58] : memref<1x3x8x32xf32, #tpu.memory_space<vmem>>, vector<1x1x8x32xf32>
    %76 = vector.shape_cast %75 : vector<1x1x8x32xf32> to vector<8x32xf32>
    %cst_59 = arith.constant dense<0.000000e+00> : vector<8x96xf32>
    %77 = tpu.matmul %76, %3, %cst_59 {dimension_numbers = #tpu.dot_dimension_numbers<[1], [0], [0], [1], [0, 0, 1, 1], [], []>} : vector<8x32xf32>, vector<32x96xf32>, vector<8x96xf32> -> vector<8x96xf32>
    %78 = vector.extract_strided_slice %77 {offsets = [0, 0], sizes = [8, 32], strides = [1, 1]} : vector<8x96xf32> to vector<8x32xf32>
    %79 = vector.extract_strided_slice %77 {offsets = [0, 32], sizes = [8, 32], strides = [1, 1]} : vector<8x96xf32> to vector<8x32xf32>
    %80 = vector.extract_strided_slice %77 {offsets = [0, 64], sizes = [8, 32], strides = [1, 1]} : vector<8x96xf32> to vector<8x32xf32>
    %81 = arith.mulf %78, %78 : vector<8x32xf32>
    %cst_60 = arith.constant dense<0.000000e+00> : vector<8x32xf32>
    %82 = tpu.matmul %81, %7, %cst_60 {dimension_numbers = #tpu.dot_dimension_numbers<[1], [0], [0], [1], [0, 0, 1, 1], [], []>} : vector<8x32xf32>, vector<32x32xf32>, vector<8x32xf32> -> vector<8x32xf32>
    %cst_61 = arith.constant 1.250000e-01 : f32
    %83 = vector.broadcast %cst_61 : f32 to vector<8x32xf32>
    %84 = arith.mulf %82, %83 : vector<8x32xf32>
    %cst_62 = arith.constant 1.1920929E-7 : f32
    %85 = vector.broadcast %cst_62 : f32 to vector<8x32xf32>
    %86 = arith.addf %84, %85 : vector<8x32xf32>
    %87 = math.rsqrt %86 : vector<8x32xf32>
    %88 = arith.mulf %78, %87 : vector<8x32xf32>
    %c3 = arith.constant 3 : index
    %c0_63 = arith.constant 0 : index
    %c0_64 = arith.constant 0 : index
    %c0_65 = arith.constant 0 : index
    %89 = vector.load %arg6[%c3, %c0_63, %c0_64, %c0_65] : memref<4x2x8x32xf32, #tpu.memory_space<vmem>>, vector<1x1x8x32xf32>
    %90 = vector.shape_cast %89 : vector<1x1x8x32xf32> to vector<8x32xf32>
    %91 = arith.mulf %88, %90 : vector<8x32xf32>
    %92 = arith.mulf %79, %87 : vector<8x32xf32>
    %c3_66 = arith.constant 3 : index
    %c1_67 = arith.constant 1 : index
    %c0_68 = arith.constant 0 : index
    %c0_69 = arith.constant 0 : index
    %93 = vector.load %arg6[%c3_66, %c1_67, %c0_68, %c0_69] : memref<4x2x8x32xf32, #tpu.memory_space<vmem>>, vector<1x1x8x32xf32>
    %94 = vector.shape_cast %93 : vector<1x1x8x32xf32> to vector<8x32xf32>
    %95 = arith.mulf %92, %94 : vector<8x32xf32>
    %96 = arith.addf %91, %95 : vector<8x32xf32>
    %97 = arith.mulf %26, %96 : vector<8x32xf32>
    %cst_70 = arith.constant dense<0.000000e+00> : vector<8x32xf32>
    %98 = tpu.matmul %97, %7, %cst_70 {dimension_numbers = #tpu.dot_dimension_numbers<[1], [0], [0], [1], [0, 0, 1, 1], [], []>} : vector<8x32xf32>, vector<32x32xf32>, vector<8x32xf32> -> vector<8x32xf32>
    %99 = arith.maximumf %50, %74 : vector<8x32xf32>
    %100 = arith.maximumf %99, %98 : vector<8x32xf32>
    %101 = arith.subf %50, %100 : vector<8x32xf32>
    %102 = math.exp %101 : vector<8x32xf32>
    %103 = arith.subf %74, %100 : vector<8x32xf32>
    %104 = math.exp %103 : vector<8x32xf32>
    %105 = arith.subf %98, %100 : vector<8x32xf32>
    %106 = math.exp %105 : vector<8x32xf32>
    %107 = arith.addf %102, %104 : vector<8x32xf32>
    %108 = arith.addf %107, %106 : vector<8x32xf32>
    %109 = tpu.reciprocal %108 {approx = true} : vector<8x32xf32> -> vector<8x32xf32>
    %110 = arith.mulf %102, %32 : vector<8x32xf32>
    %111 = arith.mulf %104, %56 : vector<8x32xf32>
    %112 = arith.mulf %106, %80 : vector<8x32xf32>
    %113 = arith.addf %110, %111 : vector<8x32xf32>
    %114 = arith.addf %113, %112 : vector<8x32xf32>
    %115 = arith.mulf %114, %109 : vector<8x32xf32>
    %cst_71 = arith.constant dense<0.000000e+00> : vector<8x32xf32>
    %116 = tpu.matmul %115, %5, %cst_71 {dimension_numbers = #tpu.dot_dimension_numbers<[1], [0], [0], [1], [0, 0, 1, 1], [], []>} : vector<8x32xf32>, vector<32x32xf32>, vector<8x32xf32> -> vector<8x32xf32>
    %c0_72 = arith.constant 0 : index
    %c0_73 = arith.constant 0 : index
    %c0_74 = arith.constant 0 : index
    %117 = vector.load %arg7[%c0_72, %c0_73, %c0_74] : memref<1x8x32xf32, #tpu.memory_space<vmem>>, vector<1x8x32xf32>
    %118 = vector.shape_cast %117 : vector<1x8x32xf32> to vector<8x32xf32>
    %119 = vector.shape_cast %116 : vector<8x32xf32> to vector<1x8x32xf32>
    tpu.vector_store %arg7[%c0_72, %c0_73, %c0_74], %119 {strides = array<i32>} : memref<1x8x32xf32, #tpu.memory_space<vmem>>, vector<1x8x32xf32>,
    return
  }
  func.func @transform_0(%arg0: i32) -> (i32, i32, i32) {
    %c0_i32 = arith.constant 0 : i32
    %c0_i32_0 = arith.constant 0 : i32
    %c0_i32_1 = arith.constant 0 : i32
    return %arg0, %c0_i32, %c0_i32_0 : i32, i32, i32
  }
  func.func @transform_1(%arg0: i32) -> (i32, i32, i32, i32) {
    %c0_i32 = arith.constant 0 : i32
    %c0_i32_0 = arith.constant 0 : i32
    %c0_i32_1 = arith.constant 0 : i32
    %c0_i32_2 = arith.constant 0 : i32
    return %arg0, %c0_i32, %c0_i32_0, %c0_i32_1 : i32, i32, i32, i32
  }
  func.func @transform_2(%arg0: i32) -> (i32, i32) {
    %c0_i32 = arith.constant 0 : i32
    %c0_i32_0 = arith.constant 0 : i32
    %c0_i32_1 = arith.constant 0 : i32
    return %c0_i32, %c0_i32_0 : i32, i32
  }
  func.func @transform_3(%arg0: i32) -> (i32, i32) {
    %c0_i32 = arith.constant 0 : i32
    %c0_i32_0 = arith.constant 0 : i32
    %c0_i32_1 = arith.constant 0 : i32
    return %c0_i32, %c0_i32_0 : i32, i32
  }
  func.func @transform_4(%arg0: i32) -> (i32, i32, i32) {
    %c0_i32 = arith.constant 0 : i32
    %c0_i32_0 = arith.constant 0 : i32
    %c0_i32_1 = arith.constant 0 : i32
    %c0_i32_2 = arith.constant 0 : i32
    return %c0_i32, %c0_i32_0, %c0_i32_1 : i32, i32, i32
  }
  func.func @transform_5(%arg0: i32) -> (i32, i32, i32, i32) {
    %c0_i32 = arith.constant 0 : i32
    %c0_i32_0 = arith.constant 0 : i32
    %c0_i32_1 = arith.constant 0 : i32
    %c0_i32_2 = arith.constant 0 : i32
    %c0_i32_3 = arith.constant 0 : i32
    return %c0_i32, %c0_i32_0, %c0_i32_1, %c0_i32_2 : i32, i32, i32, i32
  }
  func.func @transform_6(%arg0: i32) -> (i32, i32, i32) {
    %c0_i32 = arith.constant 0 : i32
    %c0_i32_0 = arith.constant 0 : i32
    %c0_i32_1 = arith.constant 0 : i32
    return %arg0, %c0_i32, %c0_i32_0 : i32, i32, i32
  }
}

</mosaic_0001>

<bundles_post_ra>
// kernel: tpu_custom_call.1
= control target key start
LH: loop header
LB: loop body
LE: loop exit
PB: predicated region body
PF: predicated region fallthrough
CT: control target
= control target key end

     0   :  { %s2757_s0 = inlined_call_operand.hbm [shape: f32[2,8,32], index: 0, kind: input, shape index: {}]   ;;  %s2758_s1 = inlined_call_operand.hbm [shape: f32[2,3,8,32], index: 1, kind: input, shape index: {}]   ;;  %s2759_s2 = inlined_call_operand.hbm [shape: f32[32,64], index: 2, kind: input, shape index: {}]   ;;  %s2760_s3 = inlined_call_operand.hbm [shape: f32[32,96], index: 3, kind: input, shape index: {}]   ;;  %s2761_s4 = inlined_call_operand.hbm [shape: f32[2,32,32], index: 4, kind: input, shape index: {}]   ;;  %s2762_s5 = inlined_call_operand.hbm [shape: f32[4,2,8,32], index: 5, kind: input, shape index: {}]   ;;  %s2763_s6 = inlined_call_operand.hbm [shape: f32[2,8,32], index: 6, kind: output, shape index: {}]  }
   0x1   :  { %2769 = sst [smem:[#allocation20_spill]] %s2757_s0 }
   0x2   :  { %2770 = sst [smem:[#allocation21_spill]] %s2759_s2 }
   0x3   :  { %11 = vsyncpa [#allocation3], 0 }
   0x4   :  { %13 = vsyncpa [#allocation3 + $0x1], 0 }
   0x5   :  { %14 = vsyncpa [#allocation6], 0 }
   0x6   :  { %16 = vsyncpa [#allocation6 + $0x1], 0 }
   0x7   :  { %17 = vsyncpa [#allocation9], 0 }
   0x8   :  { %18 = vsyncpa [#allocation12], 0 }
   0x9   :  { %19 = vsyncpa [#allocation4], 0 }
   0xa   :  { %21 = vsyncpa [#allocation4 + $0x1], 0  ;;  %s2269_s21 = smov 0   ;;  %s2271_s22 = smov 0  }
   0xb   :  { %s2273_s23 = smov 0   ;;  %s2275_s24 = smov 0  }
   0xc LB: > { %s2219_s25 = smov [#allocation7]   ;;  %s2290_s27 = sadd.s32 4294967295, %s2217_s24   ;;  %s2217_s24 = sphi %s2275_s24, %s2798_s24   ;;  %s2213_s23 = sphi %s2273_s23, %s2797_s23   ;;  %s2209_s22 = sphi %s2271_s22, %s2796_s22   ;;  %s2205_s21 = sphi %s2269_s21, %s2795_s21  }
   0xd   : > { %s206_s26 = sshll.u32 %s2219_s25, 4  ;;  %p1546_p0 = scmp.ge.s32.totalorder %s2217_s24, 1  ;;  %s2295_s26 = int_to_ptr.vmem [resolvable:$true] %s206_s26 }
   0xe   : > { %p2764_p1 = scmp.eq.s32.totalorder %s2290_s27, 0  ;;  %p194_p2 = scmp.lt.s32.totalorder %s2217_s24, 3 }
   0xf   : > { %s2220_s29 = smov [#allocation8]   ;;  %s2221_s8 = smov [#allocation10]  }
  0x10   : > { %p2297_p3 = pnand %p1546_p0, %p194_p2  ;;  %s219_s30 = sshll.u32 %s2220_s29, 4  ;;  %s2310_s30 = int_to_ptr.vmem [resolvable:$true] %s219_s30 }
  0x11   : > { %s232_s9 = sshll.u32 %s2221_s8, 4  ;;  %s2773_s2 = sld [smem:[#allocation21_spill]]  ;;  %s2312_s9 = int_to_ptr.vmem [resolvable:$true] %s232_s9 }
  0x12   : > { %s2771_s28 = scalar_select %p2297_p3, 1, 0 }
  0x13   : > { %p1869_p5 = pneg %p2297_p3 }
  0x15   : > { %p2306_p6 = pnand %p1869_p5, %p2764_p1 }
  0x17   : > { %s1963_s12 = scalar_lea.hbm %s2773_s2, 512  ;;  %p2322_p8 = pneg %p2306_p6 }
  0x18   : > { %p1964_p7 = scmp.ne.s32.totalorder %s2773_s2, %s1963_s12  ;;  %p1970_p11 = scmp.lt.u32.totalorder %s1963_s12, %s2773_s2 }
  0x1a   : > { %p1966_p9 = pnand %p2322_p8, %p1964_p7 }
  0x1c   : > { %p1967_p10 = pneg %p1966_p9 }
  0x1e   : > { %p1972_p12 = pnand %p1970_p11, %p1967_p10 }
  0x20   : > { %1975 = shalt.err (!%p1972_p12)
}
  0x21   : > { %s1976_s18 = scalar_lea.vmem %s2295_s26, 512  ;;  %p1984_p5 = scmp.lt.s32.totalorder %s2295_s26, %s2295_s26 }
  0x22   : > { %p1977_p13 = scmp.ne.s32.totalorder %s2295_s26, %s1976_s18  ;;  %p1985_p4 = scmp.lt.s32.totalorder %s1976_s18, %s1976_s18 }
  0x24   : > { %p1979_p0 = pnand %p1977_p13, %p2322_p8  ;;  %p1986_p7 = por %p1985_p4, %p1984_p5 }
  0x26   : > { %p1980_p2 = pneg %p1979_p0 }
  0x28   : > { %p1987_p9 = pnand %p1986_p7, %p1980_p2 }
  0x2a   : > { %1990 = shalt.err (!%p1987_p9)
}
  0x2b   : > { %s2766_s19 = smov 128   ;;  %s2767_s20 = smov 8  }
  0x2c   : > { %1872 = dma.hbm_to_vmem [thread:$0]  (!%p2306_p6), %s2773_s2, 512, %s2295_s26, [#allocation6], %s2766_s19, %s2766_s19, %s2767_s20  }
  0x2d   : > { %s1991_s11 = scalar_lea.hbm %s2760_s3, 512 }
  0x2e   : > { %p1992_p4 = scmp.ne.s32.totalorder %s2760_s3, %s1991_s11  ;;  %p1998_p12 = scmp.lt.u32.totalorder %s1991_s11, %s2760_s3 }
  0x30   : > { %p1994_p10 = pnand %p1992_p4, %p2322_p8 }
  0x32   : > { %p1995_p11 = pneg %p1994_p10 }
  0x34   : > { %p2000_p13 = pnand %p1998_p12, %p1995_p11 }
  0x36   : > { %2003 = shalt.err (!%p2000_p13)
}
  0x37   : > { %s2004_s26 = scalar_lea.vmem %s2310_s30, 512  ;;  %p2012_p7 = scmp.lt.s32.totalorder %s2310_s30, %s2310_s30 }
  0x38   : > { %p2005_p0 = scmp.ne.s32.totalorder %s2310_s30, %s2004_s26  ;;  %p2013_p9 = scmp.lt.s32.totalorder %s2004_s26, %s2004_s26 }
  0x3a   : > { %p2007_p2 = pnand %p2005_p0, %p2322_p8  ;;  %p2014_p4 = por %p2013_p9, %p2012_p7 }
  0x3c   : > { %p2008_p5 = pneg %p2007_p2 }
  0x3e   : > { %p2015_p10 = pnand %p2014_p4, %p2008_p5 }
  0x40   : > { %2018 = shalt.err (!%p2015_p10)
}
  0x41   : > { %1875 = dma.hbm_to_vmem [thread:$0]  (!%p2306_p6), %s2760_s3, 512, %s2310_s30, [#allocation9], %s2766_s19, %s2766_s19, %s2767_s20  }
  0x42   : > { %s2019_s8 = scalar_lea.hbm %s2761_s4, 1024 }
  0x43   : > { %p2020_p11 = scmp.ne.s32.totalorder %s2761_s4, %s2019_s8  ;;  %p2026_p0 = scmp.lt.u32.totalorder %s2019_s8, %s2761_s4 }
  0x45   : > { %p2022_p12 = pnand %p2020_p11, %p2322_p8 }
  0x47   : > { %p2023_p13 = pneg %p2022_p12 }
  0x49   : > { %p2028_p2 = pnand %p2026_p0, %p2023_p13 }
  0x4b   : > { %2031 = shalt.err (!%p2028_p2)
}
  0x4c   : > { %s2032_s30 = scalar_lea.vmem %s2312_s9, 1024  ;;  %p2040_p4 = scmp.lt.s32.totalorder %s2312_s9, %s2312_s9 }
  0x4d   : > { %p2033_p5 = scmp.ne.s32.totalorder %s2312_s9, %s2032_s30  ;;  %p2041_p10 = scmp.lt.s32.totalorder %s2032_s30, %s2032_s30 }
  0x4f   : > { %p2035_p7 = pnand %p2033_p5, %p2322_p8  ;;  %p2042_p11 = por %p2041_p10, %p2040_p4 }
  0x51   : > { %p2036_p9 = pneg %p2035_p7 }
  0x53   : > { %p2043_p12 = pnand %p2042_p11, %p2036_p9 }
  0x55   : > { %2046 = shalt.err (!%p2043_p12)
}
  0x56   : > { %1878 = dma.hbm_to_vmem [thread:$0]  (!%p2306_p6), %s2761_s4, 1024, %s2312_s9, [#allocation9], %s2766_s19, %s2766_s19, %s2767_s20  }
  0x57   : > { %s2224_s26 = smov [#allocation11]   ;;  %s2047_s29 = scalar_lea.hbm %s2762_s5, 1024 }
  0x58   : > { %s245_s17 = sshll.u32 %s2224_s26, 4  ;;  %p2048_p13 = scmp.ne.s32.totalorder %s2762_s5, %s2047_s29  ;;  %s246_s17 = int_to_ptr.vmem [resolvable:$true] %s245_s17 }
  0x59   : > { %p2054_p5 = scmp.lt.u32.totalorder %s2047_s29, %s2762_s5 }
  0x5a   : > { %p2050_p0 = pnand %p2048_p13, %p2322_p8 }
  0x5c   : > { %p2051_p2 = pneg %p2050_p0 }
  0x5e   : > { %p2056_p7 = pnand %p2054_p5, %p2051_p2 }
  0x60   : > { %2059 = shalt.err (!%p2056_p7)
}
  0x61   : > { %s2060_s9 = scalar_lea.vmem %s246_s17, 1024  ;;  %p2068_p11 = scmp.lt.s32.totalorder %s246_s17, %s246_s17 }
  0x62   : > { %p2061_p9 = scmp.ne.s32.totalorder %s246_s17, %s2060_s9  ;;  %p2069_p12 = scmp.lt.s32.totalorder %s2060_s9, %s2060_s9 }
  0x64   : > { %p2063_p4 = pnand %p2061_p9, %p2322_p8  ;;  %p2070_p1 = por %p2069_p12, %p2068_p11 }
  0x66   : > { %p2064_p10 = pneg %p2063_p4 }
  0x68   : > { %p2071_p3 = pnand %p2070_p1, %p2064_p10 }
  0x6a   : > { %2074 = shalt.err (!%p2071_p3)
}
  0x6b   : > { %1881 = dma.hbm_to_vmem [thread:$0]  (!%p2306_p6), %s2762_s5, 1024, %s246_s17, [#allocation12], %s2766_s19, %s2766_s19, %s2767_s20  }
  0x6c   : > { %s1545_s7 = sadd.s32 4294967294, %s2217_s24   ;;  %s2421_s15 = sadd.s32 1, %s2217_s24  }
  0x6d   : > { %s31_s14 = ssub.s32 %s2217_s24, %s2421_s15  ;;  %s34_s16 = sadd.s32 1, %s2213_s23 }
  0x6e   : > { %p32_p1 = scmp.eq.s32.totalorder %s31_s14, 0  ;;  %p41_p3 = scmp.ne.s32.totalorder %s2213_s23, %s2209_s22 }
  0x6f   : > { %p42_p8 = scmp.eq.s32.totalorder %s2217_s24, 0  ;;  %p47_p13 = scmp.ne.s32.totalorder %s2209_s22, %s2205_s21 }
  0x70   : > { %s2432_s26 = scalar_select %p32_p1, %s2213_s23, %s34_s16  }
  0x71   : > { %p2434_p0 = por %p42_p8, %p41_p3  ;;  %p2776_p2 = scmp.eq.s32.totalorder %s2290_s27, 0 }
  0x72   : > { %p181_p5 = scmp.eq.s32.totalorder %s2290_s27, 1  ;;  %p187_p7 = scmp.eq.s32.totalorder %s1545_s7, 1 }
  0x73   : > { %p2440_p6 = por %p2776_p2, %p47_p13  ;;  %p1897_p9 = scmp.lt.s32.totalorder %s2217_s24, 2 }
  0x74   : > { %s2447_s25 = sand.u32 1, %s2213_s23   ;;  %p2449_p4 = por %p181_p5, %p41_p3 }
  0x75   : > { %p2453_p10 = por %p187_p7, %p47_p13  ;;  %s1552_s10 = sshll.u32 %s2447_s25, 3 }
  0x76   : > { %s2778_s29 = scalar_select %p2449_p4, 1, 0 }
  0x77   : > { %s2779_s8 = scalar_select %p2453_p10, 1, 0 }
  0x78   : > { %s1553_s11 = sshll.u32 %s2217_s24, 7  ;;  %s2780_s0 = sld [smem:[#allocation20_spill]] }
  0x79   : > { %s263_s30 = scalar_lea.vmem [#allocation2], %s1552_s10  ;;  %p2468_p11 = pnand %p1897_p9, %p2434_p0 }
  0x7a   : > { %s270_s7 = sshll.u32 %s263_s30, 4  ;;  %s1844_s16 = smul.u32 24, %s2447_s25  ;;  %s2464_s7 = int_to_ptr.vmem [resolvable:$true] %s270_s7 }
  0x7b   : > { %s260_s12 = scalar_lea.sflag [#allocation3], %s2447_s25  ;;  %p2077_p1 = pneg %p2468_p11 }
  0x7e   : > { %s2462_s13 = scalar_lea.hbm %s2780_s0, %s1553_s11  ;;  %s2080_s18 = scalar_lea.hbm %s2780_s0, 256 }
  0x7f   : > { %s2075_s11 = scalar_lea.hbm %s2462_s13, 128  ;;  %p2081_p13 = scmp.lt.u32.totalorder %s2462_s13, %s2780_s0 }
  0x80   : > { %p2076_p12 = scmp.ne.s32.totalorder %s2462_s13, %s2075_s11  ;;  %p2082_p0 = scmp.lt.u32.totalorder %s2080_s18, %s2075_s11 }
  0x81   : > { %p2084_p5 = scmp.lt.u32.totalorder %s2075_s11, %s2462_s13 }
  0x82   : > { %p2078_p3 = pnand %p2077_p1, %p2076_p12  ;;  %p2083_p2 = por %p2082_p0, %p2081_p13 }
  0x84   : > { %p2079_p8 = pneg %p2078_p3  ;;  %p2085_p7 = por %p2084_p5, %p2083_p2 }
  0x86   : > { %p2086_p9 = pnand %p2085_p7, %p2079_p8 }
  0x88   : > { %2089 = shalt.err (!%p2086_p9)
}
  0x89   : > { %s2090_s19 = scalar_lea.vmem %s2464_s7, 128  ;;  %s2225_s10 = smov [#allocation2]  }
  0x8a   : > { %p2091_p12 = scmp.ne.s32.totalorder %s2464_s7, %s2090_s19  ;;  %s2095_s9 = sshll.u32 %s2225_s10, 4  ;;  %s2096_s9 = int_to_ptr.vmem [resolvable:$false] %s2095_s9 }
  0x8b   : > { %s2097_s20 = scalar_lea.vmem %s2096_s9, 256  ;;  %p2098_p4 = scmp.lt.s32.totalorder %s2464_s7, %s2096_s9 }
  0x8c   : > { %p2093_p3 = pnand %p2091_p12, %p2077_p1  ;;  %p2099_p13 = scmp.lt.s32.totalorder %s2097_s20, %s2090_s19 }
  0x8e   : > { %p2094_p10 = pneg %p2093_p3  ;;  %p2100_p0 = por %p2099_p13, %p2098_p4 }
  0x90   : > { %p2101_p2 = pnand %p2100_p0, %p2094_p10 }
  0x92   : > { %2104 = shalt.err (!%p2101_p2)
}
  0x93   : > { %1885 = dma.hbm_to_vmem [thread:$0]  (!%p2468_p11), %s2462_s13, 128, %s2464_s7, %s260_s12  }
  0x94   : > { %s1845_s11 = smul.u32 384, %s2217_s24  ;;  %s281_s18 = scalar_lea.vmem [#allocation5], %s1844_s16 }
  0x95   : > { %s288_s30 = sshll.u32 %s281_s18, 4  ;;  %s2782_s20 = sand.u32 1, %s2217_s24   ;;  %s2503_s30 = int_to_ptr.vmem [resolvable:$true] %s288_s30 }
  0x96   : > { %s2508_s9 = scalar_lea.hbm %s2758_s1, %s1845_s11  ;;  %s2512_s0 = scalar_lea.sflag [#allocation6], %s2782_s20 }
  0x97   : > { %s2105_s2 = scalar_lea.hbm %s2508_s9, 384  ;;  %s2110_s7 = scalar_lea.hbm %s2758_s1, 768 }
  0x98   : > { %p2106_p4 = scmp.ne.s32.totalorder %s2508_s9, %s2105_s2  ;;  %p2111_p5 = scmp.lt.u32.totalorder %s2508_s9, %s2758_s1 }
  0x99   : > { %p2112_p7 = scmp.lt.u32.totalorder %s2110_s7, %s2105_s2  ;;  %p2114_p12 = scmp.lt.u32.totalorder %s2105_s2, %s2508_s9 }
  0x9a   : > { %p2108_p10 = pnand %p2106_p4, %p2077_p1 }
  0x9b   : > { %p2113_p9 = por %p2112_p7, %p2111_p5 }
  0x9c   : > { %p2109_p8 = pneg %p2108_p10 }
  0x9d   : > { %p2115_p3 = por %p2114_p12, %p2113_p9 }
  0x9f   : > { %p2116_p13 = pnand %p2115_p3, %p2109_p8 }
  0xa1   : > { %2119 = shalt.err (!%p2116_p13)
}
  0xa2   : > { %s2120_s11 = scalar_lea.vmem %s2503_s30, 384  ;;  %s2226_s18 = smov [#allocation5]  }
  0xa3   : > { %p2121_p0 = scmp.ne.s32.totalorder %s2503_s30, %s2120_s11  ;;  %s2125_s10 = sshll.u32 %s2226_s18, 4  ;;  %s2126_s10 = int_to_ptr.vmem [resolvable:$false] %s2125_s10 }
  0xa4   : > { %s2127_s19 = scalar_lea.vmem %s2126_s10, 768  ;;  %p2128_p10 = scmp.lt.s32.totalorder %s2503_s30, %s2126_s10 }
  0xa5   : > { %p2123_p2 = pnand %p2121_p0, %p2077_p1  ;;  %p2129_p5 = scmp.lt.s32.totalorder %s2127_s19, %s2120_s11 }
  0xa7   : > { %p2124_p4 = pneg %p2123_p2  ;;  %p2130_p7 = por %p2129_p5, %p2128_p10 }
  0xa9   : > { %p2131_p9 = pnand %p2130_p7, %p2124_p4 }
  0xab   : > { %2134 = shalt.err (!%p2131_p9)
}
  0xac   : > { %s2783_s2 = smov 8   ;;  %s2784_s20 = smov 128  }
  0xad   : > { %1888 = dma.hbm_to_vmem [thread:$0]  (!%p2468_p11), %s2508_s9, 384, %s2503_s30, %s2512_s0, %s2784_s20, %s2784_s20, %s2783_s2  }
  0xae   : > { %p2785_p1 = scmp.ne.s32.totalorder %s2771_s28, 0 }
  0xaf   : > { %s2544_s25 = sand.u32 (!%p2785_p1), 1, %s2209_s22  }
  0xb0   : > { %300 = sbr.rel (%p2785_p1) target bundleno = 2315 (0x90b), region = 44  ;;  %s1556_s13 = sshll.u32 (!%p2785_p1), %s2544_s25, 3 }
  0xb1   : > { %s303_s7 = scalar_lea.sflag (!%p2785_p1), [#allocation3], %s2544_s25  ;;  %s2550_s14 = scalar_lea.vmem (!%p2785_p1), [#allocation2], %s1556_s13 }
  0xb7   : > { %2180 = dma.done.wait (%p2440_p6), %s303_s7, 128  }
  0xb8   : > { %2182 = vsyncadd (%p2440_p6), %s303_s7, 4294967168  ;;  %s311_s0 = sand.u32 1, %s2290_s27   ;;  %s1846_s28 = smul.u32 24, %s2544_s25 }
  0xb9   : > { %s312_s30 = scalar_lea.sflag [#allocation6], %s311_s0 }
  0xba   : > { %s2558_s9 = scalar_lea.vmem [#allocation5], %s1846_s28 }
  0xbb   : > { %2184 = dma.done.wait (%p2440_p6), %s312_s30, 384  }
  0xbc   : > { %2186 = vsyncadd (%p2440_p6), %s312_s30, 4294966912  ;;  %p2786_p11 = scmp.eq.s32.totalorder %s2290_s27, 0 }
  0xbe   : > { %2188 = dma.done.wait (%p2786_p11), [#allocation6], 512   ;;  %p2787_p8 = pmov %p2786_p11 }
  0xc0   : > { %2190 = vsyncadd (%p2787_p8), [#allocation6], 4294966784  ;;  %p2788_p12 = pmov %p2787_p8 }
  0xc1   : > { %p2789_p3 = pmov %p2787_p8 }
  0xc2   : > { %2192 = dma.done.wait (%p2788_p12), [#allocation9], 1536  }
  0xc3   : > { %2194 = vsyncadd (%p2789_p3), [#allocation9], 4294965760  ;;  %p2790_p13 = pmov %p2789_p3 }
  0xc4   : > { %p2791_p0 = pmov %p2789_p3 }
  0xc5   : > { %2196 = dma.done.wait (%p2790_p13), [#allocation12], 1024  }
  0xc6   : > { %2198 = vsyncadd (%p2791_p0), [#allocation12], 4294966272  ;;  %v2227_v0 = vmov 0.0|0.0   ;;  %vm2228_vm0 = vmmov 0   ;;  %v2229_v1 = vmov 0.0   ;;  %v366_v2 = vld [vmem:[#allocation7] sm:$0xff] }
  0xc7   : > { %1772 = vmatprep.subr.bf16.mxu0 %v2227_v0  ;;  %1648 = vmatprep.mubr.msk.f32.mxu0 %vm2228_vm0, %v2229_v1  ;;  %v367_v3 = vld [vmem:[#allocation7 + $0x8] sm:$0xff]  ;;  %v368_v4 = vld [vmem:[#allocation7 + $0x10] sm:$0xff]  ;;  %v369_v6 = vld [vmem:[#allocation7 + $0x18] sm:$0xff]  ;;  %vm383_vm1 = vcmask 261120   ;;  %s2230_s17 = smov 32   ;;  %s2231_s16 = smov 96  }
  0xc8   : > { %1778 = vmatprep.subr.bf16.mxu1 %v2227_v0  ;;  %1659 = vmatprep.mubr.msk.f32.mxu1 %vm2228_vm0, %v2229_v1  ;;  %v1773_v5 = vpack.c.bf16 %v367_v3, %v366_v2  ;;  %v1776_v7 = vpack.c.bf16 %v369_v6, %v368_v4  ;;  %v379_v8 = vld [vmem:[#allocation10 + $0x20] sm:$0xff]  ;;  %v380_v9 = vld [vmem:[#allocation10 + $0x28] sm:$0xff]  ;;  %v372_v15 = vld [vmem:[#allocation8 + $0x10] sm:$0xff]  ;;  %s2232_s12 = smov 64   ;;  %s1577_s11 = sshll.u32 %s2290_s27, 7 }
  0xc9   : > { %v370_v10 = vld [vmem:[#allocation8] sm:$0xff]  ;;  %v371_v11 = vld [vmem:[#allocation8 + $0x8] sm:$0xff]  ;;  %v2583_v12 = vpack.c.bf16 %v380_v9, %v379_v8  ;;  %v373_v16 = vld [vmem:[#allocation8 + $0x18] sm:$0xff]  ;;  %s364_s18 = scalar_lea.vmem [#allocation13], %s1556_s13  ;;  %s2712_s20 = scalar_lea.hbm %s2763_s6, %s1577_s11 }
  0xca   : > { %1774 = vmatpush3.bf16.msra.mxu0 %v1773_v5  ;;  %v365_v13 = vld [vmem:[%s2550_s14] sm:$0xff]  ;;  %v2587_v14 = vpack.c.bf16 %v371_v11, %v370_v10  ;;  %v2593_v17 = vpack.c.bf16 %v373_v16, %v372_v15  ;;  %v381_v19 = vld [vmem:[#allocation10 + $0x30] sm:$0xff]  ;;  %v382_v20 = vld [vmem:[#allocation10 + $0x38] sm:$0xff]  ;;  %s1414_s10 = sshll.u32 %s364_s18, 4  ;;  %s1401_s7 = scalar_lea.sflag [#allocation4], %s2544_s25  ;;  %s2714_s10 = int_to_ptr.vmem [resolvable:$true] %s1414_s10 }
  0xcb   : > { %1775 = vmatprep.subr.bf16.mxu0 %v2227_v0  ;;  %1780 = vmatpush3.bf16.msra.mxu1 %v2583_v12  ;;  %v554_v18 = vld [vmem:[%s2558_s9] sm:$0xff]  ;;  %v2606_v21 = vpack.c.bf16 %v382_v20, %v381_v19  ;;  %v715_v29 = vld [vmem:[#allocation11 + $0x18] sm:$0xff]  ;;  %v535_v53 = vld [vmem:[#allocation11] sm:$0xff]  ;;  %s2135_s14 = scalar_lea.vmem %s2714_s10, 128  ;;  %p2792_p2 = scmp.ne.s32.totalorder %s2778_s29, 0 }
  0xcc   : > { %1781 = vmatprep.subr.bf16.mxu1 %v2227_v0  ;;  %v543_v28 = vld [vmem:[#allocation11 + $0x8] sm:$0xff]  ;;  %v1567_v30 = vld [vmem:[%s2558_s9 + $0x8] sm:$0xff]  ;;  %v1571_v2 = vld [vmem:[%s2558_s9 + $0x10] sm:$0xff]  ;;  %p2136_p6 = scmp.ne.s32.totalorder %s2714_s10, %s2135_s14  ;;  %s2233_s27 = smov [#allocation13]  }
  0xcd   : > { %545 = vrot.lane.b32.xlu1 %v543_v28, %s2230_s17  ;;  %v707_v54 = vld [vmem:[#allocation11 + $0x10] sm:$0xff]  ;;  %v962_v63 = vld [vmem:[#allocation11 + $0x28] sm:$0xff]  ;;  %v954_v19 = vld [vmem:[#allocation11 + $0x20] sm:$0xff]  ;;  %s2139_s13 = sshll.u32 %s2233_s27, 4  ;;  %s2140_s13 = int_to_ptr.vmem [resolvable:$false] %s2139_s13 }
  0xce   : > { %1777 = vmatpush3.bf16.msra.mxu0 %v1776_v7  ;;  %p2137_p4 = pnand %p2136_p6, %p2792_p2  ;;  %s2141_s0 = scalar_lea.vmem %s2140_s13, 256 }
  0xcf   : > { %1784 = vmatprep.subr.bf16.mxu0 %v2227_v0  ;;  %1783 = vmatpush3.bf16.msra.mxu1 %v2606_v21  ;;  %p2142_p5 = scmp.lt.s32.totalorder %s2714_s10, %s2140_s13  ;;  %p2143_p7 = scmp.lt.s32.totalorder %s2141_s0, %s2135_s14 }
  0xd0   : > { %1790 = vmatprep.subr.bf16.mxu1 %v2227_v0  ;;  %p2138_p10 = pneg %p2137_p4 }
  0xd1   : > { %1649 = vmatmul.mubr.msk.f32.vlgmr.msra.gmra.mrb[0].mxu0 %vm383_vm1, %v365_v13  ;;  %717 = vrot.lane.b32.xlu1 %v715_v29, %s2230_s17  ;;  %p2144_p9 = por %p2143_p7, %p2142_p5 }
  0xd2   : > { %1786 = vmatpush3.bf16.msra.mxu0 %v2587_v14  ;;  %1670 = vmatprep.mubr.msk.f32.mxu0 %vm2228_vm0, %v2229_v1 }
  0xd3   : > { %1787 = vmatprep.subr.bf16.mxu0 %v2227_v0  ;;  %p2145_p1 = pnand %p2144_p9, %p2138_p10 }
  0xd6   : > { %1789 = vmatpush3.bf16.msra.mxu0 %v2593_v17 }
  0xd7   : > { %1796 = vmatprep.subr.bf16.mxu0 %v2227_v0 }
  0xd9   : > { %1671 = vmatmul.mubr.msk.f32.vlgmr.msra.gmra.mrb[2].mxu0 %vm383_vm1, %v554_v18  ;;  %v1209_v18 = vld [vmem:[#allocation11 + $0x38] sm:$0xff] }
  0xda   : > { %1798 = vmatpush3.bf16.msra.mxu0 %v2583_v12  ;;  %1692 = vmatprep.mubr.msk.f32.mxu0 %vm2228_vm0, %v2229_v1 }
  0xdb   : > { %1799 = vmatprep.subr.bf16.mxu0 %v2227_v0 }
  0xde   : > { %1801 = vmatpush3.bf16.msra.mxu0 %v2606_v21 }
  0xdf   : > { %1808 = vmatprep.subr.bf16.mxu0 %v2227_v0 }
 0x13f   : > { %v546_v44 = vpop.permute.xlu1 %545 }
 0x143   : > { %v718_v50 = vpop.permute.xlu1 %717 }
 0x1a4   : > { %v453_v22 = vpop.f32.mrb[0].mxu0 }
 0x1a5   : > { %v457_v23 = vmul.f32 %v453_v22, %v453_v22  ;;  %v1650_v24 = vpop.f32.mrb[1].mxu0 }
 0x1a7   : > { %1660 = vmatmul.mubr.msk.f32.vlgmr.msra.gmra.mrb[0].mxu1 %vm383_vm1, %v457_v23 }
 0x1a8   : > { %1792 = vmatpush3.bf16.msra.mxu1 %v2583_v12  ;;  %1681 = vmatprep.mubr.msk.f32.mxu1 %vm2228_vm0, %v2229_v1 }
 0x1a9   : > { %1793 = vmatprep.subr.bf16.mxu1 %v2227_v0 }
 0x1ac   : > { %v2617_v25 = vpop.f32.mrb[2].mxu0  ;;  %1795 = vmatpush3.bf16.msra.mxu1 %v2606_v21 }
 0x1ad   : > { %v628_v26 = vmul.f32 %v2617_v25, %v2617_v25  ;;  %v1672_v27 = vpop.f32.mrb[3].mxu0  ;;  %1802 = vmatprep.subr.bf16.mxu1 %v2227_v0 }
 0x1af   : > { %1682 = vmatmul.mubr.msk.f32.vlgmr.msra.gmra.mrb[2].mxu1 %vm383_vm1, %v628_v26 }
 0x1b0   : > { %1804 = vmatpush3.bf16.msra.mxu1 %v2587_v14  ;;  %1703 = vmatprep.mubr.msk.f32.mxu1 %vm2228_vm0, %v2229_v1 }
 0x1b1   : > { %1805 = vmatprep.subr.bf16.mxu1 %v2227_v0 }
 0x1b4   : > { %1807 = vmatpush3.bf16.msra.mxu1 %v2593_v17 }
 0x1b5   : > { %1814 = vmatprep.subr.bf16.mxu1 %v2227_v0 }
 0x1b7   : > { %1704 = vmatmul.mubr.msk.f32.vlgmr.msra.gmra.mrb[4].mxu1 %vm383_vm1, %v1567_v30 }
 0x1b8   : > { %1816 = vmatpush3.bf16.msra.mxu1 %v2583_v12  ;;  %1725 = vmatprep.mubr.msk.f32.mxu1 %vm2228_vm0, %v2229_v1 }
 0x1b9   : > { %1817 = vmatprep.subr.bf16.mxu1 %v2227_v0 }
 0x1bc   : > { %1819 = vmatpush3.bf16.msra.mxu1 %v2606_v21 }
 0x1bd   : > { %1826 = vmatprep.subr.bf16.mxu1 %v2227_v0 }
 0x27a   : > { %v527_v31 = vpop.f32.mrb[0].mxu1 }
 0x27b   : > { %v531_v32 = vmul.f32 0.125, %v527_v31  ;;  %v1661_v33 = vpop.f32.mrb[1].mxu1 }
 0x27d   : > { %v532_v34 = vadd.f32 1.1920929e-07, %v531_v32 }
 0x27f   : > { %1947 = vrsqrt.f32 %v532_v34 }
 0x282   : > { %v698_v35 = vpop.f32.mrb[2].mxu1 }
 0x283   : > { %v702_v36 = vmul.f32 0.125, %v698_v35  ;;  %v1683_v37 = vpop.f32.mrb[3].mxu1 }
 0x285   : > { %v703_v38 = vadd.f32 1.1920929e-07, %v702_v36 }
 0x287   : > { %1949 = vrsqrt.f32 %v703_v38 }
 0x289   : > { %v1948_v39 = vpop.eup %1947 }
 0x28a   : > { %538 = vrot.lane.b32.xlu0 %v1948_v39, %s2230_s17  ;;  %v534_v40 = vmul.f32 %v1948_v39, %v453_v22  ;;  %v2644_v47 = vpop.f32.mrb[4].mxu1 }
 0x28b   : > { %v1705_v48 = vpop.f32.mrb[5].mxu1  ;;  %v875_v62 = vmul.f32 %v2644_v47, %v2644_v47 }
 0x28c   : > { %v536_v56 = vmul.f32 %v535_v53, %v534_v40 }
 0x291   : > { %v1950_v41 = vpop.eup %1949 }
 0x292   : > { %710 = vrot.lane.b32.xlu0 %v1950_v41, %s2230_s17  ;;  %v705_v42 = vmul.f32 %v1950_v41, %v2617_v25  ;;  %v374_v41 = vld [vmem:[#allocation10] sm:$0xff] }
 0x294   : > { %v708_v57 = vmul.f32 %v707_v54, %v705_v42  ;;  %v375_v42 = vld [vmem:[#allocation10 + $0x8] sm:$0xff] }
 0x2fc   : > { %v539_v43 = vpop.permute.xlu0 %538 }
 0x2fd   : > { %v541_v45 = vmul.f32 %v539_v43, %v453_v22  ;;  %v376_v43 = vld [vmem:[#allocation10 + $0x10] sm:$0xff] }
 0x2ff   : > { %v548_v46 = vmul.f32 %v546_v44, %v541_v45  ;;  %v1839_v44 = vpack.c.bf16 %v375_v42, %v374_v41  ;;  %v377_v45 = vld [vmem:[#allocation10 + $0x18] sm:$0xff] }
 0x301   : > { %550 = vrot.lane.b32.xlu0 %v548_v46, %s2231_s16  ;;  %v1842_v46 = vpack.c.bf16 %v377_v45, %v376_v43 }
 0x304   : > { %v711_v49 = vpop.permute.xlu0 %710 }
 0x305   : > { %v713_v51 = vmul.f32 %v711_v49, %v2617_v25 }
 0x307   : > { %v720_v52 = vmul.f32 %v718_v50, %v713_v51 }
 0x309   : > { %722 = vrot.lane.b32.xlu1 %v720_v52, %s2231_s16 }
 0x30d   : > { %964 = vrot.lane.b32.xlu1 %v962_v63, %s2230_s17 }
 0x373   : > { %v551_v55 = vpop.permute.xlu0 %550 }
 0x374   : > { %v2648_v59 = vadd.f32 %v551_v55, %v536_v56 }
 0x37b   : > { %v723_v58 = vpop.permute.xlu1 %722 }
 0x37c   : > { %v725_v60 = vadd.f32 %v723_v58, %v708_v57 }
 0x37e   : > { %v726_v61 = vmul.f32 %v725_v60, %v2648_v59 }
 0x37f   : > { %v965_v11 = vpop.permute.xlu1 %964 }
 0x380   : > { %1693 = vmatmul.mubr.msk.f32.vlgmr.msra.gmra.mrb[4].mxu0 %vm383_vm1, %v726_v61 }
 0x381   : > { %1810 = vmatpush3.bf16.msra.mxu0 %v2583_v12  ;;  %1714 = vmatprep.mubr.msk.f32.mxu0 %vm2228_vm0, %v2229_v1 }
 0x382   : > { %1811 = vmatprep.subr.bf16.mxu0 %v2227_v0 }
 0x385   : > { %1813 = vmatpush3.bf16.msra.mxu0 %v2606_v21 }
 0x386   : > { %1820 = vmatprep.subr.bf16.mxu0 %v2227_v0 }
 0x388   : > { %1715 = vmatmul.mubr.msk.f32.vlgmr.msra.gmra.mrb[6].mxu0 %vm383_vm1, %v875_v62 }
 0x389   : > { %1822 = vmatpush3.bf16.msra.mxu0 %v2587_v14  ;;  %1736 = vmatprep.mubr.msk.f32.mxu0 %vm2228_vm0, %v2229_v1 }
 0x38a   : > { %1823 = vmatprep.subr.bf16.mxu0 %v2227_v0 }
 0x38d   : > { %1825 = vmatpush3.bf16.msra.mxu0 %v2593_v17 }
 0x38e   : > { %1832 = vmatprep.subr.bf16.mxu0 %v2227_v0 }
 0x390   : > { %1737 = vmatmul.mubr.msk.f32.vlgmr.msra.gmra.mrb[8].mxu0 %vm383_vm1, %v1571_v2 }
 0x391   : > { %1834 = vmatpush3.bf16.msra.mxu0 %v2583_v12  ;;  %1758 = vmatprep.mubr.msk.f32.mxu0 %vm2228_vm0, %v2229_v1 }
 0x392   : > { %1835 = vmatprep.subr.bf16.mxu0 %v2227_v0 }
 0x395   : > { %1837 = vmatpush3.bf16.msra.mxu0 %v2606_v21 }
 0x453   : > { %v2675_v3 = vpop.f32.mrb[4].mxu0 }
 0x454   : > { %v1694_v4 = vpop.f32.mrb[5].mxu0 }
 0x45b   : > { %v945_v5 = vpop.f32.mrb[6].mxu0 }
 0x45c   : > { %v949_v6 = vmul.f32 0.125, %v945_v5  ;;  %v1716_v7 = vpop.f32.mrb[7].mxu0 }
 0x45e   : > { %v950_v8 = vadd.f32 1.1920929e-07, %v949_v6 }
 0x460   : > { %1951 = vrsqrt.f32 %v950_v8 }
 0x463   : > { %v1118_v13 = vpop.f32.mrb[8].mxu0 }
 0x464   : > { %v1738_v15 = vpop.f32.mrb[9].mxu0  ;;  %v1122_v26 = vmul.f32 %v1118_v13, %v1118_v13 }
 0x46a   : > { %v1952_v9 = vpop.eup %1951 }
 0x46b   : > { %957 = vrot.lane.b32.xlu0 %v1952_v9, %s2230_s17  ;;  %v952_v10 = vmul.f32 %v1952_v9, %v2644_v47 }
 0x46d   : > { %v955_v20 = vmul.f32 %v954_v19, %v952_v10 }
 0x4dd   : > { %v958_v14 = vpop.permute.xlu0 %957 }
 0x4de   : > { %v960_v16 = vmul.f32 %v958_v14, %v2644_v47 }
 0x4e0   : > { %v967_v17 = vmul.f32 %v965_v11, %v960_v16 }
 0x4e2   : > { %969 = vrot.lane.b32.xlu0 %v967_v17, %s2231_s16 }
 0x4e6   : > { %1211 = vrot.lane.b32.xlu0 %v1209_v18, %s2230_s17 }
 0x4ea   : > { %1309 = vrot.lane.b32.xlu0 %v2617_v25, %s2232_s12 }
 0x4ee   : > { %1319 = vrot.lane.b32.xlu0 %v1118_v13, %s2232_s12 }
 0x554   : > { %v970_v22 = vpop.permute.xlu0 %969 }
 0x555   : > { %v972_v23 = vadd.f32 %v970_v22, %v955_v20 }
 0x557   : > { %v973_v24 = vmul.f32 %v972_v23, %v2648_v59 }
 0x558   : > { %v1212_v35 = vpop.permute.xlu0 %1211 }
 0x559   : > { %1726 = vmatmul.mubr.msk.f32.vlgmr.msra.gmra.mrb[6].mxu1 %vm383_vm1, %v973_v24 }
 0x55a   : > { %1828 = vmatpush3.bf16.msra.mxu1 %v2583_v12  ;;  %1747 = vmatprep.mubr.msk.f32.mxu1 %vm2228_vm0, %v2229_v1 }
 0x55b   : > { %1829 = vmatprep.subr.bf16.mxu1 %v2227_v0 }
 0x55c   : > { %v1310_v56 = vpop.permute.xlu0 %1309 }
 0x55e   : > { %1831 = vmatpush3.bf16.msra.mxu1 %v2606_v21 }
 0x55f   : > { %1838 = vmatprep.subr.bf16.mxu1 %v2227_v0 }
 0x560   : > { %v1320_v63 = vpop.permute.xlu0 %1319 }
 0x561   : > { %1748 = vmatmul.mubr.msk.f32.vlgmr.msra.gmra.mrb[8].mxu1 %vm383_vm1, %v1122_v26 }
 0x562   : > { %1769 = vmatprep.mubr.msk.f32.mxu1 %vm2228_vm0, %v2229_v1  ;;  %v1201_v1 = vld [vmem:[#allocation11 + $0x30] sm:$0xff]  ;;  %1840 = vmatpush3.bf16.msra.mxu1 %v1839_v44 }
 0x563   : > { %1841 = vmatprep.subr.bf16.mxu1 %v2227_v0 }
 0x566   : > { %1843 = vmatpush3.bf16.msra.mxu1 %v1842_v46 }
 0x62c   : > { %v1043_v25 = vpop.f32.mrb[6].mxu1 }
 0x62d   : > { %v1294_v27 = vmax.f32 %v2675_v3, %v1043_v25  ;;  %v1727_v28 = vpop.f32.mrb[7].mxu1 }
 0x634   : > { %v1192_v12 = vpop.f32.mrb[8].mxu1 }
 0x635   : > { %v1196_v29 = vmul.f32 0.125, %v1192_v12  ;;  %v1749_v30 = vpop.f32.mrb[9].mxu1 }
 0x637   : > { %v1197_v31 = vadd.f32 1.1920929e-07, %v1196_v29 }
 0x639   : > { %1953 = vrsqrt.f32 %v1197_v31 }
 0x643   : > { %v1954_v32 = vpop.eup %1953 }
 0x644   : > { %1204 = vrot.lane.b32.xlu1 %v1954_v32, %s2230_s17  ;;  %v1199_v21 = vmul.f32 %v1954_v32, %v1118_v13 }
 0x646   : > { %v1202_v37 = vmul.f32 %v1201_v1, %v1199_v21 }
 0x6b6   : > { %v1205_v33 = vpop.permute.xlu1 %1204 }
 0x6b7   : > { %v1207_v34 = vmul.f32 %v1205_v33, %v1118_v13 }
 0x6b9   : > { %v1214_v36 = vmul.f32 %v1212_v35, %v1207_v34 }
 0x6bb   : > { %1216 = vrot.lane.b32.xlu1 %v1214_v36, %s2231_s16 }
 0x6bf   : > { %1314 = vrot.lane.b32.xlu1 %v2644_v47, %s2232_s12 }
 0x72d   : > { %v1217_v38 = vpop.permute.xlu1 %1216 }
 0x72e   : > { %v1219_v39 = vadd.f32 %v1217_v38, %v1202_v37 }
 0x730   : > { %v1220_v40 = vmul.f32 %v1219_v39, %v2648_v59 }
 0x731   : > { %v1315_v0 = vpop.permute.xlu1 %1314 }
 0x732   : > { %1759 = vmatmul.mubr.msk.f32.vlgmr.msra.gmra.mrb[10].mxu0 %vm383_vm1, %v1220_v40 }
 0x805   : > { %v1290_v48 = vpop.f32.mrb[10].mxu0 }
 0x806   : > { %v1295_v47 = vmax.f32 %v1294_v27, %v1290_v48  ;;  %v1760_v49 = vpop.f32.mrb[11].mxu0 }
 0x808   : > { %v1296_v50 = vsub.f32 %v2675_v3, %v1295_v47  ;;  %v1299_v51 = vsub.f32 %v1043_v25, %v1295_v47  ;;  %v1302_v52 = vsub.f32 %v1290_v48, %v1295_v47 }
 0x80a   : > { %v1297_v53 = vmul.f32 1.442695, %v1296_v50  ;;  %v1300_v54 = vmul.f32 1.442695, %v1299_v51  ;;  %v1303_v55 = vmul.f32 1.442695, %v1302_v52 }
 0x80c   : > { %1955 = vpow2.f32 %v1297_v53 }
 0x80d   : > { %1957 = vpow2.f32 %v1300_v54 }
 0x80e   : > { %1959 = vpow2.f32 %v1303_v55 }
 0x816   : > { %v1956_v57 = vpop.eup %1955 }
 0x817   : > { %v1958_v58 = vpop.eup %1957  ;;  %v1312_v59 = vmul.f32 %v1956_v57, %v1310_v56 }
 0x818   : > { %v1960_v60 = vpop.eup %1959  ;;  %v1305_v61 = vadd.f32 %v1958_v58, %v1956_v57  ;;  %v1317_v62 = vmul.f32 %v1958_v58, %v1315_v0 }
 0x819   : > { %v1322_v3 = vmul.f32 %v1960_v60, %v1320_v63 }
 0x81a   : > { %v1306_v2 = vadd.f32 %v1960_v60, %v1305_v61  ;;  %v1323_v4 = vadd.f32 %v1317_v62, %v1312_v59 }
 0x81c   : > { %1961 = vrcp.f32 %v1306_v2  ;;  %v1324_v5 = vadd.f32 %v1323_v4, %v1322_v3 }
 0x826   : > { %v1962_v6 = vpop.eup %1961 }
 0x827   : > { %v1325_v7 = vmul.f32 %v1962_v6, %v1324_v5 }
 0x829   : > { %1770 = vmatmul.mubr.msk.f32.vlgmr.msra.gmra.mrb[10].mxu1 %vm383_vm1, %v1325_v7 }
 0x8fc   : > { %v1395_v8 = vpop.f32.mrb[10].mxu1 }
 0x8fd   : > { %1399 = vst.msk [vmem:[%s364_s18] sm:$0xff] %vm383_vm1, %v1395_v8  ;;  %v1771_v9 = vpop.f32.mrb[11].mxu1 }
 0x8fe   : > { %2148 = shalt.err (!%p2145_p1)
}
 0x8ff   : > { %s2149_s25 = scalar_lea.hbm %s2712_s20, 128  ;;  %s2153_s9 = scalar_lea.hbm %s2763_s6, 256 }
 0x900   : > { %p2150_p11 = scmp.ne.s32.totalorder %s2712_s20, %s2149_s25  ;;  %p2154_p3 = scmp.lt.u32.totalorder %s2712_s20, %s2763_s6 }
 0x901   : > { %p2155_p13 = scmp.lt.u32.totalorder %s2153_s9, %s2149_s25  ;;  %p2157_p6 = scmp.lt.u32.totalorder %s2149_s25, %s2712_s20 }
 0x902   : > { %p2151_p8 = pnand %p2150_p11, %p2792_p2 }
 0x903   : > { %p2156_p0 = por %p2155_p13, %p2154_p3 }
 0x904   : > { %p2152_p12 = pneg %p2151_p8 }
 0x905   : > { %p2158_p4 = por %p2157_p6, %p2156_p0 }
 0x907   : > { %p2159_p10 = pnand %p2158_p4, %p2152_p12 }
 0x909   : > { %2162 = shalt.err (!%p2159_p10)
}
 0x90a   : > { %1867 = dma.vmem_to_hbm [thread:$0]  (%p2792_p2), %s2714_s10, 128, %s2712_s20, %s1401_s7  }
 0x90b PF: > { %s1426_s12 = sand.u32 1, %s2205_s21   ;;  %p2793_p5 = scmp.ne.s32.totalorder %s2779_s8, 0 }
 0x90c   : > { %p2794_p7 = scmp.ge.s32.totalorder %s2217_s24, 2  ;;  %s1427_s11 = scalar_lea.sflag [#allocation4], %s1426_s12 }
 0x90e   : > { %p1890_p9 = pnand %p2794_p7, %p2793_p5 }
 0x910   : > { %2200 = dma.done.wait (!%p1890_p9), %s1427_s11, 128  }
 0x911   : > { %2202 = vsyncadd (!%p1890_p9), %s1427_s11, 4294967168  ;;  %p24_p1 = scmp.ge.s32.totalorder %s2421_s15, 4   ;;  %s2795_s21 = smov %s2209_s22 }
 0x912   : > { %s2796_s22 = smov %s2213_s23  ;;  %s2797_s23 = smov %s2432_s26 }
 0x913   : > { %s2798_s24 = smov %s2421_s15  ;;  %26 = sbr.rel (!%p24_p1) target bundleno = 12 (0xc), region = 128 }
 0x91a   :  { %1432 = vsyncpa [#allocation3], 1 }
 0x91b   :  { %1434 = vsyncpa [#allocation3 + $0x1], 1 }
 0x91c   :  { %1435 = vsyncpa [#allocation6], 1 }
 0x91d   :  { %1437 = vsyncpa [#allocation6 + $0x1], 1 }
 0x91e   :  { %1438 = vsyncpa [#allocation9], 1 }
 0x91f   :  { %1439 = vsyncpa [#allocation12], 1 }
 0x920   :  { %1440 = vsyncpa [#allocation4], 1 }
 0x921   :  { %1442 = vsyncpa [#allocation4 + $0x1], 1 }

</bundles_post_ra>
